<compile_context>
chip_gen: v6e
topology: v6e:2x2x1
jax: 0.10.0
libtpu: 0.0.40
codegen_flags: <defaults>
</compile_context>

<pallas_src>
import functools

import jax
import jax.numpy as jnp
from jax.experimental import pallas as pl
from jax.experimental.pallas import tpu as pltpu


def _vmem_limits():
    """(vmem_limit_bytes, per-step working-set budget) for this TPU generation."""
    try:
        phys = int(pltpu.get_tpu_info().vmem_capacity_bytes)
        if phys <= 0:
            raise ValueError(phys)
        # v5e/v6e: 128 MiB physical -> 96 MiB scoped; v7x: 64 MiB -> 48 MiB.
        limit = min(phys * 3 // 4, 96 * 1024 * 1024)
    except Exception:  # conservative, previously validated fallback
        limit = 48 * 1024 * 1024
    budget = limit * 4 // 5
    return limit, budget


def _factorized_reduce_kernel(x_ref, w1_ref, w2_ref, o_ref, *, lane_sliced):
    """Fused FactorizedReduce kernel.

    x_ref : (bh, 2, Wo, 2*C) -- dim 1 is the H parity (0: even rows -> conv1,
            1: odd rows -> conv2); the last dim interleaves
            [even-W-pixel channels | odd-W-pixel channels].
    w1_ref: (K, c_half) conv1 weight.  K = C (lane_sliced) or 2*C (zero-padded
            so that odd-W channel rows are zero).
    w2_ref: (K, c_half) conv2 weight (even-W channel rows zero when padded).
    o_ref : (bh, Wo, 2*c_half)
    """
    bh, _, wo, c2 = x_ref.shape
    c_in = c2 // 2
    c_half = w1_ref.shape[1]

    xx = x_ref[...]                               # one contiguous tile load
    x1 = xx[:, 0].reshape(bh * wo, c2)            # even-H rows
    x2 = xx[:, 1].reshape(bh * wo, c2)            # odd-H rows
    if lane_sliced:                               # C % 128 == 0: free lane slice
        x1 = x1[:, :c_in]                         # even-W channels
        x2 = x2[:, c_in:]                         # odd-W channels

    a = jnp.dot(x1, w1_ref[...], preferred_element_type=jnp.float32)
    b = jnp.dot(x2, w2_ref[...], preferred_element_type=jnp.float32)

    # Direct channel-slice stores (full-lane when c_half % 128 == 0; for small
    # c_half the masked-store cost is negligible next to the HBM writeback).
    o_ref[:, :, :c_half] = a.reshape(bh, wo, c_half).astype(o_ref.dtype)
    o_ref[:, :, c_half:] = b.reshape(bh, wo, c_half).astype(o_ref.dtype)


def factorized_reduce_nhwc(x_nhwc, w1, w2, *, compute_dtype=None):
    """FactorizedReduce forward, NHWC-native (preferred: no layout transposes).

    x_nhwc: (N, H, W, C) with H, W even.
    w1, w2: (C_out//2, C_in, 1, 1) PyTorch Conv2d weights (no bias).
    compute_dtype: optional operand dtype (e.g. jnp.bfloat16): halves HBM
      reads; accumulation is f32 and the output keeps x_nhwc.dtype.  When
      None, weights are cast to x_nhwc.dtype.
    returns: (N, H//2, W//2, C_out) with channels [conv1 | conv2].
    """
    N, H, W, C = x_nhwc.shape
    if H % 2 != 0 or W % 2 != 0:
        raise ValueError("Spatial dimensions must be even.")
    c_half = w1.shape[0]
    c_out = 2 * c_half
    Ho, Wo = H // 2, W // 2
    n_rows = N * Ho                         # one "row" = one output image row

    out_dtype = jnp.dtype(x_nhwc.dtype)
    cdtype = jnp.dtype(compute_dtype) if compute_dtype is not None else out_dtype
    in_isz, out_isz = cdtype.itemsize, out_dtype.itemsize

    # Free view: (N, H, W, C) -> (N*Ho, 2, Wo, 2C); dim 1 = H parity, last dim
    # = [even-W channels | odd-W channels] of one output pixel column pair.
    x_r = x_nhwc.astype(cdtype).reshape(n_rows, 2, Wo, 2 * C)

    # Conv weights as (C, c_half) matmul operands.
    w1m = jnp.transpose(w1.reshape(c_half, C)).astype(cdtype)
    w2m = jnp.transpose(w2.reshape(c_half, C)).astype(cdtype)

    lane_sliced = (C % 128 == 0)
    if lane_sliced:
        w1k, w2k, K = w1m, w2m, C           # in-kernel lane slice picks W parity
    else:
        zeros = jnp.zeros((C, c_half), dtype=cdtype)
        w1k = jnp.concatenate([w1m, zeros], axis=0)   # picks even-W channels
        w2k = jnp.concatenate([zeros, w2m], axis=0)   # picks odd-W channels
        K = 2 * C

    # ---- Tile selection ---------------------------------------------------
    vmem_limit, budget = _vmem_limits()
    weight_bytes = 2 * 2 * K * c_half * in_isz            # 2 weights, 2 buffers
    per_row = 2 * Wo * (2 * C) * in_isz + Wo * c_out * out_isz
    avail = max(budget - weight_bytes, 2 * per_row)
    bh = max(1, avail // (2 * per_row))                    # double-buffered
    # Prefer >= 4 balanced grid steps (v7x shards "parallel" across 2 TCs),
    # but never shrink a block below ~1 MiB of traffic just to add steps.
    min_rows = max(1, (1 << 20) // per_row)
    if n_rows >= 4 * min_rows:
        bh = min(bh, pl.cdiv(n_rows, 4))
    bh = int(max(1, min(bh, n_rows)))
    grid = (pl.cdiv(n_rows, bh),)

    out_r = pl.pallas_call(
        functools.partial(_factorized_reduce_kernel, lane_sliced=lane_sliced),
        out_shape=jax.ShapeDtypeStruct((n_rows, Wo, c_out), out_dtype),
        grid=grid,
        in_specs=[
            pl.BlockSpec((bh, 2, Wo, 2 * C), lambda i: (i, 0, 0, 0)),
            pl.BlockSpec((K, c_half), lambda i: (0, 0)),
            pl.BlockSpec((K, c_half), lambda i: (0, 0)),
        ],
        out_specs=pl.BlockSpec((bh, Wo, c_out), lambda i: (i, 0, 0)),
        compiler_params=pltpu.CompilerParams(
            dimension_semantics=("parallel",),
            vmem_limit_bytes=vmem_limit,
        ),
    )(x_r, w1k, w2k)

    return out_r.reshape(N, Ho, Wo, c_out)


def factorized_reduce(x_nchw, w1, w2, *, compute_dtype=None):
    """NCHW wrapper matching the PyTorch module I/O exactly.

    Prefer `factorized_reduce_nhwc`: the two boundary layout transposes here
    are pure XLA glue that roughly triples HBM traffic around the kernel.
    """
    x_nhwc = jnp.transpose(x_nchw, (0, 2, 3, 1))
    out_nhwc = factorized_reduce_nhwc(x_nhwc, w1, w2, compute_dtype=compute_dtype)
    return jnp.transpose(out_nhwc, (0, 3, 1, 2))


def _reference_nchw(x_nchw, w1, w2):
    """Pure-JAX reference with the original module semantics (NCHW)."""
    c_half = w1.shape[0]
    C = x_nchw.shape[1]
    x1 = x_nchw[:, :, 0::2, 0::2]
    x2 = x_nchw[:, :, 1::2, 1::2]
    o1 = jnp.einsum("nchw,oc->nohw", x1, w1.reshape(c_half, C))
    o2 = jnp.einsum("nchw,oc->nohw", x2, w2.reshape(c_half, C))
    return jnp.concatenate([o1, o2], axis=1)


if __name__ == "__main__":
    key = jax.random.PRNGKey(0)
    kx, kw1, kw2 = jax.random.split(key, 3)

    N, C_IN, H, W = 2, 4, 16, 16
    C_OUT = 8  # must be even

    x = jax.random.normal(kx, (N, C_IN, H, W), dtype=jnp.float32)
    # Synthetic nn.Conv2d(c_in, c_out // 2, 1, stride=2, bias=False) weights.
    w1 = jax.random.normal(kw1, (C_OUT // 2, C_IN, 1, 1), dtype=jnp.float32) * 0.1
    w2 = jax.random.normal(kw2, (C_OUT // 2, C_IN, 1, 1), dtype=jnp.float32) * 0.1

    ref = _reference_nchw(x, w1, w2)

    # Preferred NHWC-native path (no boundary transposes around the kernel).
    x_nhwc = jnp.transpose(x, (0, 2, 3, 1))
    fr_nhwc = jax.jit(factorized_reduce_nhwc, static_argnames=("compute_dtype",))
    out_nhwc = jax.block_until_ready(fr_nhwc(x_nhwc, w1, w2))
    assert out_nhwc.shape == (N, H // 2, W // 2, C_OUT), out_nhwc.shape
    assert jnp.allclose(jnp.transpose(out_nhwc, (0, 3, 1, 2)), ref,
                        atol=1e-5, rtol=1e-5), "NHWC path mismatch vs reference"

    # Module-compatible NCHW wrapper.
    fr = jax.jit(factorized_reduce, static_argnames=("compute_dtype",))
    out_nchw = jax.block_until_ready(fr(x, w1, w2))
    assert out_nchw.shape == (N, C_OUT, H // 2, W // 2), out_nchw.shape
    assert jnp.allclose(out_nchw, ref, atol=1e-5, rtol=1e-5), \
        "NCHW wrapper mismatch vs reference"

    print("KERNEL_OK")
</pallas_src>

<mosaic_0001>
module attributes {stable_mosaic.version = 11 : i64} {
  func.func @_factorized_reduce_kernel(%arg0: i32, %arg1: memref<16x2x8x8xf32, #tpu.memory_space<vmem>>, %arg2: memref<8x4xf32, #tpu.memory_space<vmem>>, %arg3: memref<8x4xf32, #tpu.memory_space<vmem>>, %arg4: memref<16x8x8xf32, #tpu.memory_space<vmem>>) attributes {dimension_semantics = [#tpu.dimension_semantics<parallel>], iteration_bounds = array<i64: 1>, scalar_prefetch = 0 : i64, scratch_operands = 0 : i64, tpu.core_type = #tpu.core_type<tc>, window_params = [{transform_indices = @transform_0, window_bounds = array<i64: 16, 2, 8, 8>}, {pipeline_mode = #tpu.pipeline_mode<synchronous>, transform_indices = @transform_1, window_bounds = array<i64: 8, 4>}, {pipeline_mode = #tpu.pipeline_mode<synchronous>, transform_indices = @transform_2, window_bounds = array<i64: 8, 4>}, {transform_indices = @transform_3, window_bounds = array<i64: 16, 8, 8>}]} {
    %c0 = arith.constant 0 : index
    %c0_0 = arith.constant 0 : index
    %c0_1 = arith.constant 0 : index
    %c0_2 = arith.constant 0 : index
    %0 = vector.load %arg1[%c0, %c0_0, %c0_1, %c0_2] : memref<16x2x8x8xf32, #tpu.memory_space<vmem>>, vector<16x2x8x8xf32>
    %1 = vector.extract_strided_slice %0 {offsets = [0, 0, 0, 0], sizes = [16, 1, 8, 8], strides = [1, 1, 1, 1]} : vector<16x2x8x8xf32> to vector<16x1x8x8xf32>
    %2 = vector.shape_cast %1 : vector<16x1x8x8xf32> to vector<16x8x8xf32>
    %3 = vector.shape_cast %2 : vector<16x8x8xf32> to vector<128x8xf32>
    %4 = vector.extract_strided_slice %0 {offsets = [0, 1, 0, 0], sizes = [16, 1, 8, 8], strides = [1, 1, 1, 1]} : vector<16x2x8x8xf32> to vector<16x1x8x8xf32>
    %5 = vector.shape_cast %4 : vector<16x1x8x8xf32> to vector<16x8x8xf32>
    %6 = vector.shape_cast %5 : vector<16x8x8xf32> to vector<128x8xf32>
    %c0_3 = arith.constant 0 : index
    %c0_4 = arith.constant 0 : index
    %7 = vector.load %arg2[%c0_3, %c0_4] : memref<8x4xf32, #tpu.memory_space<vmem>>, vector<8x4xf32>
    %cst = arith.constant dense<0.000000e+00> : vector<128x4xf32>
    %8 = tpu.matmul %3, %7, %cst {dimension_numbers = #tpu.dot_dimension_numbers<[1], [0], [0], [1], [0, 0, 1, 1], [], []>} : vector<128x8xf32>, vector<8x4xf32>, vector<128x4xf32> -> vector<128x4xf32>
    %c0_5 = arith.constant 0 : index
    %c0_6 = arith.constant 0 : index
    %9 = vector.load %arg3[%c0_5, %c0_6] : memref<8x4xf32, #tpu.memory_space<vmem>>, vector<8x4xf32>
    %cst_7 = arith.constant dense<0.000000e+00> : vector<128x4xf32>
    %10 = tpu.matmul %6, %9, %cst_7 {dimension_numbers = #tpu.dot_dimension_numbers<[1], [0], [0], [1], [0, 0, 1, 1], [], []>} : vector<128x8xf32>, vector<8x4xf32>, vector<128x4xf32> -> vector<128x4xf32>
    %11 = vector.shape_cast %8 : vector<128x4xf32> to vector<16x8x4xf32>
    %c0_8 = arith.constant 0 : index
    %c0_9 = arith.constant 0 : index
    %c0_10 = arith.constant 0 : index
    %12 = vector.load %arg4[%c0_8, %c0_9, %c0_10] : memref<16x8x8xf32, #tpu.memory_space<vmem>>, vector<16x8x4xf32>
    tpu.vector_store %arg4[%c0_8, %c0_9, %c0_10], %11 {strides = array<i32>} : memref<16x8x8xf32, #tpu.memory_space<vmem>>, vector<16x8x4xf32>,
    %13 = vector.shape_cast %10 : vector<128x4xf32> to vector<16x8x4xf32>
    %c0_11 = arith.constant 0 : index
    %c0_12 = arith.constant 0 : index
    %c4 = arith.constant 4 : index
    %14 = vector.load %arg4[%c0_11, %c0_12, %c4] : memref<16x8x8xf32, #tpu.memory_space<vmem>>, vector<16x8x4xf32>
    tpu.vector_store %arg4[%c0_11, %c0_12, %c4], %13 {strides = array<i32>} : memref<16x8x8xf32, #tpu.memory_space<vmem>>, vector<16x8x4xf32>,
    return
  }
  func.func @transform_0(%arg0: i32) -> (i32, i32, i32, i32) {
    %c0_i32 = arith.constant 0 : i32
    %c0_i32_0 = arith.constant 0 : i32
    %c0_i32_1 = arith.constant 0 : i32
    %c0_i32_2 = arith.constant 0 : i32
    return %arg0, %c0_i32, %c0_i32_0, %c0_i32_1 : i32, i32, i32, i32
  }
  func.func @transform_1(%arg0: i32) -> (i32, i32) {
    %c0_i32 = arith.constant 0 : i32
    %c0_i32_0 = arith.constant 0 : i32
    %c0_i32_1 = arith.constant 0 : i32
    return %c0_i32, %c0_i32_0 : i32, i32
  }
  func.func @transform_2(%arg0: i32) -> (i32, i32) {
    %c0_i32 = arith.constant 0 : i32
    %c0_i32_0 = arith.constant 0 : i32
    %c0_i32_1 = arith.constant 0 : i32
    return %c0_i32, %c0_i32_0 : i32, i32
  }
  func.func @transform_3(%arg0: i32) -> (i32, i32, i32) {
    %c0_i32 = arith.constant 0 : i32
    %c0_i32_0 = arith.constant 0 : i32
    %c0_i32_1 = arith.constant 0 : i32
    return %arg0, %c0_i32, %c0_i32_0 : i32, i32, i32
  }
}

</mosaic_0001>

<bundles_post_ra>
// kernel: factorized_reduce_nhwc.1
= control target key start
LH: loop header
LB: loop body
LE: loop exit
PB: predicated region body
PF: predicated region fallthrough
CT: control target
= control target key end

     0   :  { %vm48_vm0 = vcmask 64512   ;;  %s903_s0 = inlined_call_operand.vmem [shape: f32[16,2,8,8], index: 0, kind: input, shape index: {}]   ;;  %s904_s1 = inlined_call_operand.vmem [shape: f32[8,4], index: 1, kind: input, shape index: {}]   ;;  %s905_s2 = inlined_call_operand.vmem [shape: f32[8,4], index: 2, kind: input, shape index: {}]   ;;  %s906_s3 = inlined_call_operand.hbm [shape: f32[16,8,8], index: 3, kind: output, shape index: {}]  }
   0x1   :  { %v242_v0 = vld [vmem:[%s905_s2] sm:$0xff]  ;;  %v16_v1 = vld [vmem:[%s903_s0 + $0x8] sm:$0xff]  ;;  %v18_v2 = vld [vmem:[%s903_s0 + $0x18] sm:$0xff] }
   0x2   :  { %642 = vmatprep.subr.mxu1 %v242_v0  ;;  %644 = vmatprep.mubr.msk.f32.mxu1 %vm48_vm0, %v16_v1  ;;  %v20_v3 = vld [vmem:[%s903_s0 + $0x28] sm:$0xff]  ;;  %v22_v4 = vld [vmem:[%s903_s0 + $0x38] sm:$0xff]  ;;  %v47_v6 = vld [vmem:[%s904_s1] sm:$0xff] }
   0x3   :  { %643 = vmatpush3.msra.mxu1 %v242_v0  ;;  %v24_v5 = vld [vmem:[%s903_s0 + $0x48] sm:$0xff]  ;;  %616 = vmatprep.subr.mxu0 %v47_v6  ;;  %v15_v7 = vld [vmem:[%s903_s0] sm:$0xff]  ;;  %v17_v8 = vld [vmem:[%s903_s0 + $0x10] sm:$0xff] }
   0x4   :  { %645 = vmatmul.mubr.msk.f32.vlgmr.msra.gmra.mxu1 %vm48_vm0, %v18_v2  ;;  %617 = vmatpush3.msra.mxu0 %v47_v6  ;;  %v19_v9 = vld [vmem:[%s903_s0 + $0x20] sm:$0xff]  ;;  %v26_v10 = vld [vmem:[%s903_s0 + $0x58] sm:$0xff]  ;;  %v28_v11 = vld [vmem:[%s903_s0 + $0x68] sm:$0xff] }
   0x5   :  { %647 = vmatprep.mubr.msk.f32.mxu1 %vm48_vm0, %v20_v3  ;;  %618 = vmatprep.mubr.msk.f32.mxu0 %vm48_vm0, %v15_v7  ;;  %v21_v12 = vld [vmem:[%s903_s0 + $0x30] sm:$0xff]  ;;  %v23_v13 = vld [vmem:[%s903_s0 + $0x40] sm:$0xff] }
   0x6   :  { %619 = vmatmul.mubr.msk.f32.vlgmr.msra.gmra.mxu0 %vm48_vm0, %v17_v8 }
   0x7   :  { %621 = vmatprep.mubr.msk.f32.mxu0 %vm48_vm0, %v19_v9 }
   0x8   :  { %648 = vmatmul.mubr.msk.f32.gmra.mxu1 %vm48_vm0, %v22_v4 }
   0x9   :  { %650 = vmatprep.mubr.msk.f32.mxu1 %vm48_vm0, %v24_v5 }
   0xc   :  { %651 = vmatmul.mubr.msk.f32.gmra.mxu1 %vm48_vm0, %v26_v10 }
   0xd   :  { %8 = vsyncpa [#allocation3], 0  ;;  %653 = vmatprep.mubr.msk.f32.mxu1 %vm48_vm0, %v28_v11  ;;  %v30_v14 = vld [vmem:[%s903_s0 + $0x78] sm:$0xff]  ;;  %v32_v15 = vld [vmem:[%s903_s0 + $0x88] sm:$0xff]  ;;  %622 = vmatmul.mubr.msk.f32.gmra.mxu0 %vm48_vm0, %v21_v12  ;;  %s694_s21 = smov 4   ;;  %vm436_vm1 = vcmask 31744  }
   0xe   :  { %624 = vmatprep.mubr.msk.f32.mxu0 %vm48_vm0, %v23_v13  ;;  %v25_v16 = vld [vmem:[%s903_s0 + $0x50] sm:$0xff]  ;;  %v27_v17 = vld [vmem:[%s903_s0 + $0x60] sm:$0xff]  ;;  %v34_v18 = vld [vmem:[%s903_s0 + $0x98] sm:$0xff]  ;;  %vm517_vm2 = vcmask 64544  }
   0xf   :  { %v36_v19 = vld [vmem:[%s903_s0 + $0xa8] sm:$0xff]  ;;  %v29_v20 = vld [vmem:[%s903_s0 + $0x70] sm:$0xff]  ;;  %v31_v21 = vld [vmem:[%s903_s0 + $0x80] sm:$0xff] }
  0x10   :  { %654 = vmatmul.mubr.msk.f32.gmra.mxu1 %vm48_vm0, %v30_v14  ;;  %v38_v22 = vld [vmem:[%s903_s0 + $0xb8] sm:$0xff]  ;;  %v40_v23 = vld [vmem:[%s903_s0 + $0xc8] sm:$0xff]  ;;  %v33_v24 = vld [vmem:[%s903_s0 + $0x90] sm:$0xff] }
  0x11   :  { %656 = vmatprep.mubr.msk.f32.mxu1 %vm48_vm0, %v32_v15  ;;  %625 = vmatmul.mubr.msk.f32.gmra.mxu0 %vm48_vm0, %v25_v16  ;;  %v35_v25 = vld [vmem:[%s903_s0 + $0xa0] sm:$0xff]  ;;  %v42_v26 = vld [vmem:[%s903_s0 + $0xd8] sm:$0xff]  ;;  %v44_v27 = vld [vmem:[%s903_s0 + $0xe8] sm:$0xff] }
  0x12   :  { %627 = vmatprep.mubr.msk.f32.mxu0 %vm48_vm0, %v27_v17  ;;  %v37_v28 = vld [vmem:[%s903_s0 + $0xb0] sm:$0xff]  ;;  %v39_v29 = vld [vmem:[%s903_s0 + $0xc0] sm:$0xff]  ;;  %v46_v30 = vld [vmem:[%s903_s0 + $0xf8] sm:$0xff] }
  0x13   :  { %v41_v31 = vld [vmem:[%s903_s0 + $0xd0] sm:$0xff]  ;;  %v43_v32 = vld [vmem:[%s903_s0 + $0xe0] sm:$0xff] }
  0x14   :  { %657 = vmatmul.mubr.msk.f32.gmra.mxu1 %vm48_vm0, %v34_v18  ;;  %v45_v33 = vld [vmem:[%s903_s0 + $0xf0] sm:$0xff]  ;;  %s695_s0 = smov [#allocation2]  }
  0x15   :  { %659 = vmatprep.mubr.msk.f32.mxu1 %vm48_vm0, %v36_v19  ;;  %628 = vmatmul.mubr.msk.f32.gmra.mxu0 %vm48_vm0, %v29_v20  ;;  %s539_s22 = sshll.u32 %s695_s0, 4  ;;  %s540_s22 = int_to_ptr.vmem [resolvable:$true] %s539_s22 }
  0x16   :  { %630 = vmatprep.mubr.msk.f32.mxu0 %vm48_vm0, %v31_v21  ;;  %s672_s23 = scalar_lea.vmem %s540_s22, 2048  ;;  %p677_p1 = scmp.lt.s32.totalorder %s540_s22, %s540_s22 }
  0x17   :  { %p673_p0 = scmp.ne.s32.totalorder %s540_s22, %s672_s23  ;;  %p678_p2 = scmp.lt.s32.totalorder %s672_s23, %s672_s23 }
  0x18   :  { %660 = vmatmul.mubr.msk.f32.gmra.mxu1 %vm48_vm0, %v38_v22 }
  0x19   :  { %662 = vmatprep.mubr.msk.f32.mxu1 %vm48_vm0, %v40_v23  ;;  %631 = vmatmul.mubr.msk.f32.gmra.mxu0 %vm48_vm0, %v33_v24  ;;  %p679_p3 = por %p678_p2, %p677_p1 }
  0x1a   :  { %633 = vmatprep.mubr.msk.f32.mxu0 %vm48_vm0, %v35_v25 }
  0x1b   :  { %p680_p4 = pnand %p679_p3, %p673_p0 }
  0x1c   :  { %663 = vmatmul.mubr.msk.f32.gmra.mxu1 %vm48_vm0, %v42_v26 }
  0x1d   :  { %665 = vmatprep.mubr.msk.f32.mxu1 %vm48_vm0, %v44_v27  ;;  %634 = vmatmul.mubr.msk.f32.gmra.mxu0 %vm48_vm0, %v37_v28 }
  0x1e   :  { %636 = vmatprep.mubr.msk.f32.mxu0 %vm48_vm0, %v39_v29 }
  0x20   :  { %666 = vmatmul.mubr.msk.f32.gmra.mxu1 %vm48_vm0, %v46_v30 }
  0x21   :  { %637 = vmatmul.mubr.msk.f32.gmra.mxu0 %vm48_vm0, %v41_v31 }
  0x22   :  { %639 = vmatprep.mubr.msk.f32.mxu0 %vm48_vm0, %v43_v32 }
  0x25   :  { %640 = vmatmul.mubr.msk.f32.gmra.mxu0 %vm48_vm0, %v45_v33 }
  0xc4   :  { %v646_v34 = vpop.f32.mrf.mxu1 }
  0xc5   :  { %471 = vrot.lane.b32.xlu0 %v646_v34, %s694_s21 }
  0xc6   :  { %v357_v35 = vpop.f32.mrf.mxu1  ;;  %v620_v38 = vpop.f32.mrf.mxu0 }
  0xc7   :  { %438 = vst.msk [vmem:[#allocation2 + $0x8] sm:$0xff] %vm436_vm1, %v620_v38 }
  0xc8   :  { %v649_v36 = vpop.f32.mrf.mxu1  ;;  %v163_v40 = vpop.f32.mrf.mxu0 }
  0xc9   :  { %469 = vrot.lane.b32.xlu0 %v357_v35, %s694_s21  ;;  %475 = vrot.lane.b32.xlu1 %v649_v36, %s694_s21  ;;  %437 = vst.msk [vmem:[#allocation2] sm:$0xff] %vm436_vm1, %v163_v40 }
  0xca   :  { %v367_v37 = vpop.f32.mrf.mxu1 }
  0xcc   :  { %v652_v39 = vpop.f32.mrf.mxu1 }
  0xcd   :  { %473 = vrot.lane.b32.xlu1 %v367_v37, %s694_s21  ;;  %v623_v42 = vpop.f32.mrf.mxu0 }
  0xce   :  { %v377_v41 = vpop.f32.mrf.mxu1  ;;  %440 = vst.msk [vmem:[#allocation2 + $0x18] sm:$0xff] %vm436_vm1, %v623_v42 }
  0xcf   :  { %477 = vrot.lane.b32.xlu0 %v377_v41, %s694_s21  ;;  %v173_v44 = vpop.f32.mrf.mxu0 }
  0xd0   :  { %v655_v43 = vpop.f32.mrf.mxu1  ;;  %439 = vst.msk [vmem:[#allocation2 + $0x10] sm:$0xff] %vm436_vm1, %v173_v44 }
  0xd1   :  { %479 = vrot.lane.b32.xlu1 %v652_v39, %s694_s21  ;;  %v626_v46 = vpop.f32.mrf.mxu0 }
  0xd2   :  { %v387_v45 = vpop.f32.mrf.mxu1  ;;  %442 = vst.msk [vmem:[#allocation2 + $0x28] sm:$0xff] %vm436_vm1, %v626_v46 }
  0xd3   :  { %481 = vrot.lane.b32.xlu0 %v387_v45, %s694_s21  ;;  %v183_v48 = vpop.f32.mrf.mxu0 }
  0xd4   :  { %v658_v47 = vpop.f32.mrf.mxu1  ;;  %441 = vst.msk [vmem:[#allocation2 + $0x20] sm:$0xff] %vm436_vm1, %v183_v48 }
  0xd5   :  { %483 = vrot.lane.b32.xlu1 %v655_v43, %s694_s21  ;;  %v629_v50 = vpop.f32.mrf.mxu0 }
  0xd6   :  { %v397_v49 = vpop.f32.mrf.mxu1  ;;  %444 = vst.msk [vmem:[#allocation2 + $0x38] sm:$0xff] %vm436_vm1, %v629_v50 }
  0xd7   :  { %485 = vrot.lane.b32.xlu0 %v397_v49, %s694_s21  ;;  %v193_v52 = vpop.f32.mrf.mxu0 }
  0xd8   :  { %v661_v51 = vpop.f32.mrf.mxu1  ;;  %443 = vst.msk [vmem:[#allocation2 + $0x30] sm:$0xff] %vm436_vm1, %v193_v52 }
  0xd9   :  { %487 = vrot.lane.b32.xlu1 %v658_v47, %s694_s21  ;;  %v632_v54 = vpop.f32.mrf.mxu0 }
  0xda   :  { %v407_v53 = vpop.f32.mrf.mxu1  ;;  %446 = vst.msk [vmem:[#allocation2 + $0x48] sm:$0xff] %vm436_vm1, %v632_v54 }
  0xdb   :  { %489 = vrot.lane.b32.xlu0 %v407_v53, %s694_s21  ;;  %v203_v56 = vpop.f32.mrf.mxu0 }
  0xdc   :  { %v664_v55 = vpop.f32.mrf.mxu1  ;;  %445 = vst.msk [vmem:[#allocation2 + $0x40] sm:$0xff] %vm436_vm1, %v203_v56 }
  0xdd   :  { %491 = vrot.lane.b32.xlu1 %v661_v51, %s694_s21  ;;  %v635_v58 = vpop.f32.mrf.mxu0 }
  0xde   :  { %v417_v57 = vpop.f32.mrf.mxu1  ;;  %448 = vst.msk [vmem:[#allocation2 + $0x58] sm:$0xff] %vm436_vm1, %v635_v58 }
  0xdf   :  { %493 = vrot.lane.b32.xlu0 %v417_v57, %s694_s21  ;;  %v213_v60 = vpop.f32.mrf.mxu0 }
  0xe0   :  { %v667_v59 = vpop.f32.mrf.mxu1  ;;  %447 = vst.msk [vmem:[#allocation2 + $0x50] sm:$0xff] %vm436_vm1, %v213_v60 }
  0xe1   :  { %495 = vrot.lane.b32.xlu1 %v664_v55, %s694_s21  ;;  %v638_v62 = vpop.f32.mrf.mxu0 }
  0xe2   :  { %v427_v61 = vpop.f32.mrf.mxu1  ;;  %450 = vst.msk [vmem:[#allocation2 + $0x68] sm:$0xff] %vm436_vm1, %v638_v62 }
  0xe3   :  { %497 = vrot.lane.b32.xlu0 %v427_v61, %s694_s21  ;;  %v223_v63 = vpop.f32.mrf.mxu0 }
  0xe4   :  { %449 = vst.msk [vmem:[#allocation2 + $0x60] sm:$0xff] %vm436_vm1, %v223_v63 }
  0xe5   :  { %499 = vrot.lane.b32.xlu1 %v667_v59, %s694_s21  ;;  %v641_v0 = vpop.f32.mrf.mxu0 }
  0xe6   :  { %452 = vst.msk [vmem:[#allocation2 + $0x78] sm:$0xff] %vm436_vm1, %v641_v0 }
  0xe7   :  { %v233_v1 = vpop.f32.mrf.mxu0 }
  0xe8   :  { %451 = vst.msk [vmem:[#allocation2 + $0x70] sm:$0xff] %vm436_vm1, %v233_v1 }
 0x137   :  { %v472_v2 = vpop.permute.xlu0 %471 }
 0x138   :  { %519 = vst.msk [vmem:[#allocation2 + $0x8] sm:$0xff] %vm517_vm2, %v472_v2 }
 0x13b   :  { %v470_v3 = vpop.permute.xlu0 %469  ;;  %v476_v4 = vpop.permute.xlu1 %475 }
 0x13c   :  { %518 = vst.msk [vmem:[#allocation2] sm:$0xff] %vm517_vm2, %v470_v3  ;;  %521 = vst.msk [vmem:[#allocation2 + $0x18] sm:$0xff] %vm517_vm2, %v476_v4 }
 0x13f   :  { %v474_v5 = vpop.permute.xlu1 %473 }
 0x140   :  { %520 = vst.msk [vmem:[#allocation2 + $0x10] sm:$0xff] %vm517_vm2, %v474_v5 }
 0x141   :  { %v478_v6 = vpop.permute.xlu0 %477 }
 0x142   :  { %522 = vst.msk [vmem:[#allocation2 + $0x20] sm:$0xff] %vm517_vm2, %v478_v6 }
 0x143   :  { %v480_v7 = vpop.permute.xlu1 %479 }
 0x144   :  { %523 = vst.msk [vmem:[#allocation2 + $0x28] sm:$0xff] %vm517_vm2, %v480_v7 }
 0x145   :  { %v482_v8 = vpop.permute.xlu0 %481 }
 0x146   :  { %524 = vst.msk [vmem:[#allocation2 + $0x30] sm:$0xff] %vm517_vm2, %v482_v8 }
 0x147   :  { %v484_v9 = vpop.permute.xlu1 %483 }
 0x148   :  { %525 = vst.msk [vmem:[#allocation2 + $0x38] sm:$0xff] %vm517_vm2, %v484_v9 }
 0x149   :  { %v486_v10 = vpop.permute.xlu0 %485 }
 0x14a   :  { %526 = vst.msk [vmem:[#allocation2 + $0x40] sm:$0xff] %vm517_vm2, %v486_v10 }
 0x14b   :  { %v488_v11 = vpop.permute.xlu1 %487 }
 0x14c   :  { %527 = vst.msk [vmem:[#allocation2 + $0x48] sm:$0xff] %vm517_vm2, %v488_v11 }
 0x14d   :  { %v490_v12 = vpop.permute.xlu0 %489 }
 0x14e   :  { %528 = vst.msk [vmem:[#allocation2 + $0x50] sm:$0xff] %vm517_vm2, %v490_v12 }
 0x14f   :  { %v492_v13 = vpop.permute.xlu1 %491 }
 0x150   :  { %529 = vst.msk [vmem:[#allocation2 + $0x58] sm:$0xff] %vm517_vm2, %v492_v13 }
 0x151   :  { %v494_v14 = vpop.permute.xlu0 %493 }
 0x152   :  { %530 = vst.msk [vmem:[#allocation2 + $0x60] sm:$0xff] %vm517_vm2, %v494_v14 }
 0x153   :  { %v496_v15 = vpop.permute.xlu1 %495 }
 0x154   :  { %531 = vst.msk [vmem:[#allocation2 + $0x68] sm:$0xff] %vm517_vm2, %v496_v15 }
 0x155   :  { %v498_v16 = vpop.permute.xlu0 %497 }
 0x156   :  { %532 = vst.msk [vmem:[#allocation2 + $0x70] sm:$0xff] %vm517_vm2, %v498_v16 }
 0x157   :  { %v500_v17 = vpop.permute.xlu1 %499 }
 0x158   :  { %533 = vst.msk [vmem:[#allocation2 + $0x78] sm:$0xff] %vm517_vm2, %v500_v17 }
 0x159   :  { %683 = shalt.err (!%p680_p4)
}
 0x15a   :  { %s696_s24 = smov 128   ;;  %s697_s25 = smov 8  }
 0x15b   :  { %545 = dma.vmem_to_hbm [thread:$0]  %s540_s22, 2048, %s906_s3, [#allocation3], %s696_s24, %s696_s24, %s697_s25  }
 0x15c   :  { %692 = dma.done.wait [#allocation3], 2048  }
 0x15d   :  { %693 = vsyncadd [#allocation3], 4294965248 }
 0x15e   :  { %549 = vsyncpa [#allocation3], 1 }

</bundles_post_ra>
